<compile_context>
chip_gen: v7x
topology: tpu7x:2x2x1
jax: 0.10.0
libtpu: 0.0.40
codegen_flags: <defaults>
</compile_context>

<pallas_src>
import jax
import jax.numpy as jnp
from jax import lax
from jax.experimental import pallas as pl
from jax.experimental.pallas import tpu as pltpu


def _round_up(x, m):
    return (x + m - 1) // m * m


def critic_kernel(s_ref, a_ref, ws_ref, wa_ref, b_ref, wo_ref, bo_ref, out_ref):
    # Fused first layer: both input-branch matmuls + pre-summed bias (f32 acc).
    h = (jnp.dot(s_ref[...], ws_ref[...], preferred_element_type=jnp.float32)
         + jnp.dot(a_ref[...], wa_ref[...], preferred_element_type=jnp.float32)
         + b_ref[...])
    h = jnp.maximum(h, 0.0)
    # Output layer transposed so the batch maps to lanes:
    #   [1, H] contracted with [tb, H] over H  ->  [1, tb]  (lane-dense store).
    # TODO(synk): if lower_as_mlir shows a per-step vxpose of h here, switch to
    # a VPU multiply + small reduce; XLU slots are idle so it is hidden today.
    q = lax.dot_general(wo_ref[...], h, (((1,), (1,)), ((), ())),
                        preferred_element_type=jnp.float32)
    out_ref[...] = q + bo_ref[0, 0]          # scalar bias from SMEM


def critic_forward(state, action, packed_params, *, tile_b=4096):
    """state: [B, num_state], action: [B, num_action] -> q_value: [B, 1]."""
    ws_t, wa_t, b_sa, wo_row, bo = packed_params
    B, num_state = state.shape
    num_action = action.shape[1]
    H = ws_t.shape[1]

    # Batch tile: 128-aligned (lane-dense [1, tb] output blocks), large enough
    # that each grid step moves a few hundred KB, capped at ~half the batch so
    # the grid has >= 2 steps when B is large (v7x megacore sharding), and
    # small enough that double-buffered lane-padded input tiles + the [tb, H]
    # intermediate stay well under the 32 MiB VMEM budget on every generation.
    tb = max(128, min(int(tile_b), _round_up(-(-B // 2), 128)))
    grid = (pl.cdiv(B, tb),)

    q_row = pl.pallas_call(
        critic_kernel,
        out_shape=jax.ShapeDtypeStruct((1, B), jnp.float32),
        grid=grid,
        in_specs=[
            pl.BlockSpec((tb, num_state), lambda i: (i, 0)),    # state tile (pipelined)
            pl.BlockSpec((tb, num_action), lambda i: (i, 0)),   # action tile (pipelined)
            pl.BlockSpec((num_state, H), lambda i: (0, 0)),     # ws (VMEM-resident)
            pl.BlockSpec((num_action, H), lambda i: (0, 0)),    # wa (VMEM-resident)
            pl.BlockSpec((1, H), lambda i: (0, 0)),             # fused bias (resident)
            pl.BlockSpec((1, H), lambda i: (0, 0)),             # output weight row
            pl.BlockSpec(memory_space=pltpu.SMEM),              # scalar output bias
        ],
        out_specs=pl.BlockSpec((1, tb), lambda i: (0, i)),      # lane-dense [1, tb]
        compiler_params=pltpu.CompilerParams(
            dimension_semantics=("parallel",),
            vmem_limit_bytes=32 * 1024 * 1024,
        ),
    )(state, action, ws_t, wa_t, b_sa, wo_row, bo)

    # Back to the PyTorch layout [B, 1].
    return q_row[0, :][:, None]


def init_critic_params(key, num_state, num_action, num_neuro):
    """Deterministic parameter init mirroring the PyTorch __init__ recipe."""
    k1, k2, k3, k4 = jax.random.split(key, 4)
    # layer_input_s: normal(0, 0.1) weight, constant 0.1 bias
    ws = 0.1 * jax.random.normal(k1, (num_neuro, num_state), jnp.float32)
    bs = jnp.full((1, num_neuro), 0.1, jnp.float32)
    # layer_input_a: normal(0, 0.1) weight, constant 0.1 bias
    wa = 0.1 * jax.random.normal(k2, (num_neuro, num_action), jnp.float32)
    ba = jnp.full((1, num_neuro), 0.1, jnp.float32)
    # layer_output: PyTorch default uniform(-1/sqrt(fan_in), 1/sqrt(fan_in))
    bound = 1.0 / jnp.sqrt(jnp.float32(num_neuro))
    wo = jax.random.uniform(k3, (1, num_neuro), jnp.float32, -bound, bound)
    bo = jax.random.uniform(k4, (1, 1), jnp.float32, -bound, bound)
    # weights stored transposed ([in, out]) for row-major matmul in the kernel
    return (ws.T, bs, wa.T, ba, wo.T, bo)


def pack_critic_params(params):
    """Pre-fuse the two biases and orient the output weight for the kernel."""
    ws_t, bs, wa_t, ba, wo_t, bo = params
    return (ws_t,            # [num_state,  H]
            wa_t,            # [num_action, H]
            bs + ba,         # [1, H] fused first-layer bias
            wo_t.T,          # [1, H] output weight row
            bo)              # [1, 1] scalar output bias (SMEM)


def critic_reference(state, action, params):
    ws_t, bs, wa_t, ba, wo_t, bo = params
    s = state @ ws_t + bs
    a = action @ wa_t + ba
    return jnp.maximum(s + a, 0.0) @ wo_t + bo


if __name__ == "__main__":
    num_state, num_action, num_neuro = 16, 4, 32
    key = jax.random.PRNGKey(0)
    k_p = jax.random.fold_in(key, 12345)

    params = init_critic_params(k_p, num_state, num_action, num_neuro)
    packed = pack_critic_params(params)

    # batch=8: tiny single-block case.  batch=200: multi-step grid with a
    # partial (unpadded) last block.
    for batch in (8, 200):
        k_s, k_a = jax.random.split(jax.random.fold_in(key, batch))
        state = jax.random.normal(k_s, (batch, num_state), jnp.float32)
        action = jax.random.normal(k_a, (batch, num_action), jnp.float32)

        q = critic_forward(state, action, packed)
        jax.block_until_ready(q)

        q_ref = critic_reference(state, action, params)
        assert q.shape == (batch, 1)
        assert jnp.allclose(q, q_ref, atol=1e-5, rtol=1e-5)

    print("KERNEL_OK")
</pallas_src>

<mosaic_0001>
module attributes {stable_mosaic.version = 11 : i64} {
  func.func @critic_kernel(%arg0: i32, %arg1: memref<128x16xf32, #tpu.memory_space<vmem>>, %arg2: memref<128x4xf32, #tpu.memory_space<vmem>>, %arg3: memref<16x32xf32, #tpu.memory_space<vmem>>, %arg4: memref<4x32xf32, #tpu.memory_space<vmem>>, %arg5: memref<1x32xf32, #tpu.memory_space<vmem>>, %arg6: memref<1x32xf32, #tpu.memory_space<vmem>>, %arg7: memref<1x1xf32, #tpu.memory_space<smem>>, %arg8: memref<1x128xf32, #tpu.memory_space<vmem>>) attributes {dimension_semantics = [#tpu.dimension_semantics<parallel>], iteration_bounds = array<i64: 1>, scalar_prefetch = 0 : i64, scratch_operands = 0 : i64, tpu.core_type = #tpu.core_type<tc>, window_params = [{transform_indices = @transform_0, window_bounds = array<i64: 128, 16>}, {transform_indices = @transform_1, window_bounds = array<i64: 128, 4>}, {pipeline_mode = #tpu.pipeline_mode<synchronous>, transform_indices = @transform_2, window_bounds = array<i64: 16, 32>}, {pipeline_mode = #tpu.pipeline_mode<synchronous>, transform_indices = @transform_3, window_bounds = array<i64: 4, 32>}, {pipeline_mode = #tpu.pipeline_mode<synchronous>, transform_indices = @transform_4, window_bounds = array<i64: 1, 32>}, {pipeline_mode = #tpu.pipeline_mode<synchronous>, transform_indices = @transform_5, window_bounds = array<i64: 1, 32>}, {transform_indices = @transform_6, window_bounds = array<i64: 1, 1>}, {transform_indices = @transform_7, window_bounds = array<i64: 1, 128>}]} {
    %c0 = arith.constant 0 : index
    %c0_0 = arith.constant 0 : index
    %0 = vector.load %arg1[%c0, %c0_0] : memref<128x16xf32, #tpu.memory_space<vmem>>, vector<128x16xf32>
    %c0_1 = arith.constant 0 : index
    %c0_2 = arith.constant 0 : index
    %1 = vector.load %arg3[%c0_1, %c0_2] : memref<16x32xf32, #tpu.memory_space<vmem>>, vector<16x32xf32>
    %cst = arith.constant dense<0.000000e+00> : vector<128x32xf32>
    %2 = tpu.matmul %0, %1, %cst {dimension_numbers = #tpu.dot_dimension_numbers<[1], [0], [0], [1], [0, 0, 1, 1], [], []>} : vector<128x16xf32>, vector<16x32xf32>, vector<128x32xf32> -> vector<128x32xf32>
    %c0_3 = arith.constant 0 : index
    %c0_4 = arith.constant 0 : index
    %3 = vector.load %arg2[%c0_3, %c0_4] : memref<128x4xf32, #tpu.memory_space<vmem>>, vector<128x4xf32>
    %c0_5 = arith.constant 0 : index
    %c0_6 = arith.constant 0 : index
    %4 = vector.load %arg4[%c0_5, %c0_6] : memref<4x32xf32, #tpu.memory_space<vmem>>, vector<4x32xf32>
    %cst_7 = arith.constant dense<0.000000e+00> : vector<128x32xf32>
    %5 = tpu.matmul %3, %4, %cst_7 {dimension_numbers = #tpu.dot_dimension_numbers<[1], [0], [0], [1], [0, 0, 1, 1], [], []>} : vector<128x4xf32>, vector<4x32xf32>, vector<128x32xf32> -> vector<128x32xf32>
    %6 = arith.addf %2, %5 : vector<128x32xf32>
    %c0_8 = arith.constant 0 : index
    %c0_9 = arith.constant 0 : index
    %7 = vector.load %arg5[%c0_8, %c0_9] : memref<1x32xf32, #tpu.memory_space<vmem>>, vector<1x32xf32>
    %8 = vector.broadcast %7 : vector<1x32xf32> to vector<128x32xf32>
    %9 = arith.addf %6, %8 : vector<128x32xf32>
    %cst_10 = arith.constant 0.000000e+00 : f32
    %10 = vector.broadcast %cst_10 : f32 to vector<128x32xf32>
    %11 = arith.maximumf %9, %10 : vector<128x32xf32>
    %c0_11 = arith.constant 0 : index
    %c0_12 = arith.constant 0 : index
    %12 = vector.load %arg6[%c0_11, %c0_12] : memref<1x32xf32, #tpu.memory_space<vmem>>, vector<1x32xf32>
    %cst_13 = arith.constant dense<0.000000e+00> : vector<1x128xf32>
    %13 = tpu.matmul %12, %11, %cst_13 {dimension_numbers = #tpu.dot_dimension_numbers<[1], [1], [0], [0], [0, 0, 1, 0], [], []>} : vector<1x32xf32>, vector<128x32xf32>, vector<1x128xf32> -> vector<1x128xf32>
    %c0_14 = arith.constant 0 : index
    %c0_15 = arith.constant 0 : index
    %14 = memref.load %arg7[%c0_14, %c0_15] : memref<1x1xf32, #tpu.memory_space<smem>>
    %15 = vector.broadcast %14 : f32 to vector<1x128xf32>
    %16 = arith.addf %13, %15 : vector<1x128xf32>
    %c0_16 = arith.constant 0 : index
    %c0_17 = arith.constant 0 : index
    %17 = vector.load %arg8[%c0_16, %c0_17] : memref<1x128xf32, #tpu.memory_space<vmem>>, vector<1x128xf32>
    tpu.vector_store %arg8[%c0_16, %c0_17], %16 {strides = array<i32>} : memref<1x128xf32, #tpu.memory_space<vmem>>, vector<1x128xf32>,
    return
  }
  func.func @transform_0(%arg0: i32) -> (i32, i32) {
    %c0_i32 = arith.constant 0 : i32
    %c0_i32_0 = arith.constant 0 : i32
    return %arg0, %c0_i32 : i32, i32
  }
  func.func @transform_1(%arg0: i32) -> (i32, i32) {
    %c0_i32 = arith.constant 0 : i32
    %c0_i32_0 = arith.constant 0 : i32
    return %arg0, %c0_i32 : i32, i32
  }
  func.func @transform_2(%arg0: i32) -> (i32, i32) {
    %c0_i32 = arith.constant 0 : i32
    %c0_i32_0 = arith.constant 0 : i32
    %c0_i32_1 = arith.constant 0 : i32
    return %c0_i32, %c0_i32_0 : i32, i32
  }
  func.func @transform_3(%arg0: i32) -> (i32, i32) {
    %c0_i32 = arith.constant 0 : i32
    %c0_i32_0 = arith.constant 0 : i32
    %c0_i32_1 = arith.constant 0 : i32
    return %c0_i32, %c0_i32_0 : i32, i32
  }
  func.func @transform_4(%arg0: i32) -> (i32, i32) {
    %c0_i32 = arith.constant 0 : i32
    %c0_i32_0 = arith.constant 0 : i32
    %c0_i32_1 = arith.constant 0 : i32
    return %c0_i32, %c0_i32_0 : i32, i32
  }
  func.func @transform_5(%arg0: i32) -> (i32, i32) {
    %c0_i32 = arith.constant 0 : i32
    %c0_i32_0 = arith.constant 0 : i32
    %c0_i32_1 = arith.constant 0 : i32
    return %c0_i32, %c0_i32_0 : i32, i32
  }
  func.func @transform_6(%arg0: i32) -> (i32, i32) {
    %c0_i32 = arith.constant 0 : i32
    %c0_i32_0 = arith.constant 0 : i32
    %c0_i32_1 = arith.constant 0 : i32
    return %c0_i32, %c0_i32_0 : i32, i32
  }
  func.func @transform_7(%arg0: i32) -> (i32, i32) {
    %c0_i32 = arith.constant 0 : i32
    %c0_i32_0 = arith.constant 0 : i32
    return %c0_i32, %arg0 : i32, i32
  }
}

</mosaic_0001>

<bundles_post_ra>
// kernel: tpu_custom_call.1
= control target key start
LH: loop header
LB: loop body
LE: loop exit
PB: predicated region body
PF: predicated region fallthrough
CT: control target
= control target key end

     0   :  { %13 = vsyncpa [#allocation4], 0  ;;  %s1148_s0 = inlined_call_operand.hbm [shape: f32[8,16], index: 0, kind: input, shape index: {}]   ;;  %s1149_s1 = inlined_call_operand.vmem [shape: f32[8,4], index: 1, kind: input, shape index: {}]   ;;  %s1150_s2 = inlined_call_operand.vmem [shape: f32[16,32], index: 2, kind: input, shape index: {}]   ;;  %s1151_s3 = inlined_call_operand.vmem [shape: f32[4,32], index: 3, kind: input, shape index: {}]   ;;  %s1152_s4 = inlined_call_operand.vmem [shape: f32[1,32], index: 4, kind: input, shape index: {}]   ;;  %s1153_s5 = inlined_call_operand.vmem [shape: f32[1,32], index: 5, kind: input, shape index: {}]   ;;  %s1154_s6 = inlined_call_operand.<no memory space> [shape: f32[1,1], index: 6, kind: input, shape index: {}]   ;;  %s1155_s7 = inlined_call_operand.hbm [shape: f32[1,8], index: 7, kind: output, shape index: {}]  }
   0x1   :  { %14 = vsyncpa [#allocation5], 0 }
   0x2   :  { %19 = vsyncadd [#allocation4], 1920  ;;  %s948_s24 = smov [#allocation3]   ;;  %s900_s28 = scalar_lea.hbm %s1148_s0, 128 }
   0x3   :  { %s20_s25 = sshll.u32 %s948_s24, 4  ;;  %p901_p0 = scmp.ne.s32.totalorder %s1148_s0, %s900_s28  ;;  %s21_s25 = int_to_ptr.vmem [resolvable:$true] %s20_s25 }
   0x4   :  { %p904_p1 = scmp.lt.u32.totalorder %s900_s28, %s1148_s0 }
   0x6   :  { %p906_p2 = pnand %p904_p1, %p901_p0 }
   0x8   :  { %909 = shalt.err (!%p906_p2)
}
   0x9   :  { %s910_s10 = scalar_lea.vmem %s21_s25, 128  ;;  %s914_s11 = scalar_lea.vmem %s21_s25, 2048 }
   0xa   :  { %p911_p3 = scmp.ne.s32.totalorder %s21_s25, %s910_s10  ;;  %p915_p4 = scmp.lt.s32.totalorder %s21_s25, %s21_s25 }
   0xb   :  { %p916_p5 = scmp.lt.s32.totalorder %s914_s11, %s910_s10 }
   0xd   :  { %p917_p6 = por %p916_p5, %p915_p4 }
   0xf   :  { %p918_p7 = pnand %p917_p6, %p911_p3 }
  0x11   :  { %921 = shalt.err (!%p918_p7)
}
  0x12   :  { %s949_s12 = smov 128   ;;  %s950_s13 = smov 8  }
  0x13   :  { %26 = dma.hbm_to_vmem [thread:$0]  %s1148_s0, 128, %s21_s25, [#allocation4], %s949_s12, %s949_s12, %s950_s13  }
  0x14   :  { %944 = dma.done.wait [#allocation4], 2048  }
  0x15   :  { %945 = vsyncadd [#allocation4], 4294965248  ;;  %vm126_vm0 = vcmask 1043456   ;;  %vm77_vm1 = vcmask 31744   ;;  %v76_v0 = vld [vmem:[%s1151_s3] sm:$0xf] }
  0x16   :  { %v60_v1 = vld [vmem:[%s1149_s1] sm:$0xff]  ;;  %v61_v2 = vld [vmem:[%s1149_s1 + $0x8] sm:$0xff]  ;;  %752 = vmatprep.subr.msk.mxu0 %vm126_vm0, %v76_v0  ;;  %v62_v5 = vld [vmem:[%s1149_s1 + $0x10] sm:$0xff]  ;;  %vm275_vm2 = vcmask 130048   ;;  %v951_v36 = vmov 0.0|0.0   ;;  %vm952_vm3 = vmmov 0  }
  0x17   :  { %754 = vmatprep.mubr.msk.f32.mxu0 %vm77_vm1, %v60_v1  ;;  %v58_v3 = vld [vmem:[%s1150_s2] sm:$0xff]  ;;  %v59_v4 = vld [vmem:[%s1150_s2 + $0x8] sm:$0xff]  ;;  %753 = vmatpush3.msk.msra.mxu0 %vm126_vm0, %v76_v0  ;;  %v63_v7 = vld [vmem:[%s1149_s1 + $0x18] sm:$0xff]  ;;  %v953_v37 = vmov 0.0   ;;  %vm511_vm4 = vcmask 261120   ;;  %s954_s2 = smov [#allocation6]  }
  0x18   :  { %v841_v6 = vpack.c.bf16 %v59_v4, %v58_v3  ;;  %755 = vmatmul.mubr.msk.f32.vlgmr.msra.gmra.mrb[0].mxu0 %vm77_vm1, %v61_v2  ;;  %v64_v8 = vld [vmem:[%s1149_s1 + $0x20] sm:$0xff]  ;;  %v65_v9 = vld [vmem:[%s1149_s1 + $0x28] sm:$0xff]  ;;  %v66_v10 = vld [vmem:[%s1149_s1 + $0x30] sm:$0xff]  ;;  %845 = vmatprep.subr.bf16.mxu1 %v951_v36  ;;  %s640_s30 = sshll.u32 %s954_s2, 4  ;;  %s641_s30 = int_to_ptr.vmem [resolvable:$true] %s640_s30 }
  0x19   :  { %757 = vmatprep.mubr.msk.f32.mxu0 %vm77_vm1, %v62_v5  ;;  %v67_v11 = vld [vmem:[%s1149_s1 + $0x38] sm:$0xff]  ;;  %v68_v12 = vld [vmem:[%s1149_s1 + $0x40] sm:$0xff]  ;;  %v69_v13 = vld [vmem:[%s1149_s1 + $0x48] sm:$0xff]  ;;  %838 = vmatprep.mubr.msk.f32.mxu1 %vm952_vm3, %v953_v37  ;;  %s922_s8 = scalar_lea.vmem %s641_s30, 16  ;;  %s926_s9 = scalar_lea.vmem %s641_s30, 32 }
  0x1a   :  { %842 = vmatprep.subr.bf16.mxu0 %v841_v6  ;;  %v70_v14 = vld [vmem:[%s1149_s1 + $0x50] sm:$0xff]  ;;  %v71_v15 = vld [vmem:[%s1149_s1 + $0x58] sm:$0xff]  ;;  %v72_v16 = vld [vmem:[%s1149_s1 + $0x60] sm:$0xff]  ;;  %p923_p8 = scmp.ne.s32.totalorder %s641_s30, %s922_s8  ;;  %p927_p9 = scmp.lt.s32.totalorder %s641_s30, %s641_s30 }
  0x1b   :  { %844 = vmatpush3.bf16.msra.mxu0 %v841_v6  ;;  %v73_v17 = vld [vmem:[%s1149_s1 + $0x68] sm:$0xff]  ;;  %v74_v18 = vld [vmem:[%s1149_s1 + $0x70] sm:$0xff]  ;;  %v75_v19 = vld [vmem:[%s1149_s1 + $0x78] sm:$0xff]  ;;  %p928_p10 = scmp.lt.s32.totalorder %s926_s9, %s922_s8 }
  0x1c   :  { %758 = vmatmul.mubr.msk.f32.gmra.mrb[2].mxu0 %vm77_vm1, %v63_v7  ;;  %v42_v20 = vld [vmem:[#allocation3] sm:$0xff]  ;;  %v43_v21 = vld [vmem:[#allocation3 + $0x8] sm:$0xff]  ;;  %v44_v22 = vld [vmem:[#allocation3 + $0x10] sm:$0xff] }
  0x1d   :  { %760 = vmatprep.mubr.msk.f32.mxu0 %vm77_vm1, %v64_v8  ;;  %v45_v23 = vld [vmem:[#allocation3 + $0x18] sm:$0xff]  ;;  %v46_v24 = vld [vmem:[#allocation3 + $0x20] sm:$0xff]  ;;  %v47_v25 = vld [vmem:[#allocation3 + $0x28] sm:$0xff]  ;;  %p929_p11 = por %p928_p10, %p927_p9 }
  0x1e   :  { %v48_v26 = vld [vmem:[#allocation3 + $0x30] sm:$0xff]  ;;  %v49_v27 = vld [vmem:[#allocation3 + $0x38] sm:$0xff]  ;;  %v50_v28 = vld [vmem:[#allocation3 + $0x40] sm:$0xff] }
  0x1f   :  { %v51_v29 = vld [vmem:[#allocation3 + $0x48] sm:$0xff]  ;;  %v52_v30 = vld [vmem:[#allocation3 + $0x50] sm:$0xff]  ;;  %v53_v31 = vld [vmem:[#allocation3 + $0x58] sm:$0xff]  ;;  %p930_p12 = pnand %p929_p11, %p923_p8 }
  0x20   :  { %761 = vmatmul.mubr.msk.f32.gmra.mrb[4].mxu0 %vm77_vm1, %v65_v9  ;;  %v54_v32 = vld [vmem:[#allocation3 + $0x60] sm:$0xff]  ;;  %v55_v33 = vld [vmem:[#allocation3 + $0x68] sm:$0xff]  ;;  %v56_v34 = vld [vmem:[#allocation3 + $0x70] sm:$0xff] }
  0x21   :  { %763 = vmatprep.mubr.msk.f32.mxu0 %vm77_vm1, %v66_v10  ;;  %v57_v35 = vld [vmem:[#allocation3 + $0x78] sm:$0xff]  ;;  %v682_v38 = vld [vmem:[%s1152_s4] ss:$0 sm:$0xff]  ;;  %vm1102_vm5 = vmpackc.low %vm511_vm4, %vm511_vm4 }
  0x24   :  { %764 = vmatmul.mubr.msk.f32.gmra.mrb[6].mxu0 %vm77_vm1, %v67_v11 }
  0x25   :  { %766 = vmatprep.mubr.msk.f32.mxu0 %vm77_vm1, %v68_v12 }
  0x28   :  { %767 = vmatmul.mubr.msk.f32.gmra.mrb[8].mxu0 %vm77_vm1, %v69_v13 }
  0x29   :  { %769 = vmatprep.mubr.msk.f32.mxu0 %vm77_vm1, %v70_v14 }
  0x2c   :  { %770 = vmatmul.mubr.msk.f32.gmra.mrb[10].mxu0 %vm77_vm1, %v71_v15 }
  0x2d   :  { %772 = vmatprep.mubr.msk.f32.mxu0 %vm77_vm1, %v72_v16 }
  0x30   :  { %773 = vmatmul.mubr.msk.f32.gmra.mrb[12].mxu0 %vm77_vm1, %v73_v17 }
  0x31   :  { %775 = vmatprep.mubr.msk.f32.mxu0 %vm77_vm1, %v74_v18 }
  0x34   :  { %776 = vmatmul.mubr.msk.f32.gmra.mrb[14].mxu0 %vm77_vm1, %v75_v19 }
  0x35   :  { %782 = vmatprep.mubr.msk.f32.mxu0 %vm275_vm2, %v42_v20 }
  0x38   :  { %783 = vmatmul.mubr.msk.f32.vlgmr.msra.gmra.mrb[0].mxu0 %vm275_vm2, %v43_v21 }
  0x39   :  { %785 = vmatprep.mubr.msk.f32.mxu0 %vm275_vm2, %v44_v22 }
  0x3c   :  { %786 = vmatmul.mubr.msk.f32.gmra.mrb[2].mxu0 %vm275_vm2, %v45_v23 }
  0x3d   :  { %788 = vmatprep.mubr.msk.f32.mxu0 %vm275_vm2, %v46_v24 }
  0x40   :  { %789 = vmatmul.mubr.msk.f32.gmra.mrb[4].mxu0 %vm275_vm2, %v47_v25 }
  0x41   :  { %791 = vmatprep.mubr.msk.f32.mxu0 %vm275_vm2, %v48_v26 }
  0x44   :  { %792 = vmatmul.mubr.msk.f32.gmra.mrb[6].mxu0 %vm275_vm2, %v49_v27 }
  0x45   :  { %794 = vmatprep.mubr.msk.f32.mxu0 %vm275_vm2, %v50_v28 }
  0x48   :  { %795 = vmatmul.mubr.msk.f32.gmra.mrb[8].mxu0 %vm275_vm2, %v51_v29 }
  0x49   :  { %797 = vmatprep.mubr.msk.f32.mxu0 %vm275_vm2, %v52_v30 }
  0x4c   :  { %798 = vmatmul.mubr.msk.f32.gmra.mrb[10].mxu0 %vm275_vm2, %v53_v31 }
  0x4d   :  { %800 = vmatprep.mubr.msk.f32.mxu0 %vm275_vm2, %v54_v32  ;;  %v508_v32 = vld [vmem:[%s1153_s5] sm:$0x1] }
  0x50   :  { %801 = vmatmul.mubr.msk.f32.gmra.mrb[12].mxu0 %vm275_vm2, %v55_v33  ;;  %v510_v33 = vstv %s1154_s6 }
  0x51   :  { %803 = vmatprep.mubr.msk.f32.mxu0 %vm275_vm2, %v56_v34 }
  0x54   :  { %804 = vmatmul.mubr.msk.f32.gmra.mrb[14].mxu0 %vm275_vm2, %v57_v35 }
 0x10b   :  { %v784_v39 = vpop.f32.mrb[0].mxu0 }
 0x10c   :  { %v477_v40 = vadd.f32 %v784_v39, %v682_v38  ;;  %v390_v41 = vpop.f32.mrb[1].mxu0 }
 0x10d   :  { %v476_v42 = vadd.f32 %v682_v38, %v390_v41 }
 0x10e   :  { %v493_v43 = vmax.f32 %v477_v40, 0.0 }
 0x10f   :  { %v492_v44 = vmax.f32 %v476_v42, 0.0  ;;  %v787_v45 = vpop.f32.mrb[2].mxu0 }
 0x110   :  { %v479_v46 = vadd.f32 %v787_v45, %v682_v38  ;;  %v400_v47 = vpop.f32.mrb[3].mxu0 }
 0x111   :  { %v846_v49 = vpack.c.bf16 %v493_v43, %v492_v44  ;;  %v478_v50 = vadd.f32 %v682_v38, %v400_v47 }
 0x112   :  { %v495_v51 = vmax.f32 %v479_v46, 0.0 }
 0x113   :  { %v494_v52 = vmax.f32 %v478_v50, 0.0  ;;  %v790_v53 = vpop.f32.mrb[4].mxu0  ;;  %848 = vmatpush3.bf16.xpose.msk.msra.mxu1 %vm1102_vm5, %v846_v49 }
 0x114   :  { %v481_v54 = vadd.f32 %v790_v53, %v682_v38  ;;  %v410_v55 = vpop.f32.mrb[5].mxu0  ;;  %849 = vmatprep.subr.bf16.mxu1 %v951_v36 }
 0x115   :  { %v850_v56 = vpack.c.bf16 %v495_v51, %v494_v52  ;;  %v480_v57 = vadd.f32 %v682_v38, %v410_v55 }
 0x116   :  { %v497_v58 = vmax.f32 %v481_v54, 0.0 }
 0x117   :  { %v496_v59 = vmax.f32 %v480_v57, 0.0  ;;  %v793_v60 = vpop.f32.mrb[6].mxu0 }
 0x118   :  { %v483_v61 = vadd.f32 %v793_v60, %v682_v38  ;;  %v420_v62 = vpop.f32.mrb[7].mxu0 }
 0x119   :  { %v854_v63 = vpack.c.bf16 %v497_v58, %v496_v59  ;;  %v482_v0 = vadd.f32 %v682_v38, %v420_v62 }
 0x11a   :  { %v499_v1 = vmax.f32 %v483_v61, 0.0 }
 0x11b   :  { %v498_v2 = vmax.f32 %v482_v0, 0.0  ;;  %v796_v3 = vpop.f32.mrb[8].mxu0  ;;  %852 = vmatpush3.bf16.xpose.msk.msra.mxu1 %vm1102_vm5, %v850_v56 }
 0x11c   :  { %v485_v4 = vadd.f32 %v796_v3, %v682_v38  ;;  %v430_v5 = vpop.f32.mrb[9].mxu0  ;;  %853 = vmatprep.subr.bf16.mxu1 %v951_v36 }
 0x11d   :  { %v858_v6 = vpack.c.bf16 %v499_v1, %v498_v2  ;;  %v484_v7 = vadd.f32 %v682_v38, %v430_v5 }
 0x11e   :  { %v501_v8 = vmax.f32 %v485_v4, 0.0 }
 0x11f   :  { %v500_v9 = vmax.f32 %v484_v7, 0.0  ;;  %v799_v10 = vpop.f32.mrb[10].mxu0 }
 0x120   :  { %v487_v11 = vadd.f32 %v799_v10, %v682_v38  ;;  %v440_v12 = vpop.f32.mrb[11].mxu0 }
 0x121   :  { %v862_v13 = vpack.c.bf16 %v501_v8, %v500_v9  ;;  %v486_v14 = vadd.f32 %v682_v38, %v440_v12 }
 0x122   :  { %v503_v15 = vmax.f32 %v487_v11, 0.0 }
 0x123   :  { %v502_v16 = vmax.f32 %v486_v14, 0.0  ;;  %v802_v17 = vpop.f32.mrb[12].mxu0  ;;  %856 = vmatpush3.bf16.xpose.msk.msra.mxu1 %vm1102_vm5, %v854_v63 }
 0x124   :  { %v489_v18 = vadd.f32 %v802_v17, %v682_v38  ;;  %v450_v19 = vpop.f32.mrb[13].mxu0  ;;  %857 = vmatprep.subr.bf16.mxu1 %v951_v36 }
 0x125   :  { %v866_v20 = vpack.c.bf16 %v503_v15, %v502_v16  ;;  %v488_v21 = vadd.f32 %v682_v38, %v450_v19 }
 0x126   :  { %v505_v22 = vmax.f32 %v489_v18, 0.0 }
 0x127   :  { %v504_v23 = vmax.f32 %v488_v21, 0.0  ;;  %v805_v24 = vpop.f32.mrb[14].mxu0 }
 0x128   :  { %v491_v25 = vadd.f32 %v805_v24, %v682_v38  ;;  %v460_v26 = vpop.f32.mrb[15].mxu0 }
 0x129   :  { %v870_v27 = vpack.c.bf16 %v505_v22, %v504_v23  ;;  %v490_v28 = vadd.f32 %v682_v38, %v460_v26 }
 0x12a   :  { %v507_v29 = vmax.f32 %v491_v25, 0.0 }
 0x12b   :  { %v506_v30 = vmax.f32 %v490_v28, 0.0  ;;  %860 = vmatpush3.bf16.xpose.msk.msra.mxu1 %vm1102_vm5, %v858_v6 }
 0x12c   :  { %861 = vmatprep.subr.bf16.mxu1 %v951_v36 }
 0x12d   :  { %v874_v31 = vpack.c.bf16 %v507_v29, %v506_v30 }
 0x133   :  { %864 = vmatpush3.bf16.xpose.msk.msra.mxu1 %vm1102_vm5, %v862_v13 }
 0x134   :  { %865 = vmatprep.subr.bf16.mxu1 %v951_v36 }
 0x13b   :  { %868 = vmatpush3.bf16.xpose.msk.msra.mxu1 %vm1102_vm5, %v866_v20 }
 0x13c   :  { %869 = vmatprep.subr.bf16.mxu1 %v951_v36 }
 0x143   :  { %872 = vmatpush3.bf16.xpose.msk.msra.mxu1 %vm1102_vm5, %v870_v27 }
 0x144   :  { %873 = vmatprep.subr.bf16.mxu1 %v951_v36 }
 0x14b   :  { %876 = vmatpush3.bf16.xpose.msk.msra.mxu1 %vm1102_vm5, %v874_v31 }
 0x152   :  { %839 = vmatmul.mubr.msk.f32.vlgmr.msra.gmra.mrb[0].mxu1 %vm511_vm4, %v508_v32 }
 0x225   :  { %v629_v34 = vpop.f32.mrb[0].mxu1 }
 0x226   :  { %v630_v35 = vadd.f32 %v629_v34, %v510_v33  ;;  %v840_v37 = vpop.f32.mrb[1].mxu1 }
 0x228   :  { %633 = vst [vmem:[#allocation6] sm:$0x1] %v630_v35 }
 0x229   :  { %933 = shalt.err (!%p930_p12)
}
 0x22a   :  { %s934_s11 = scalar_lea.hbm %s1155_s7, 16 }
 0x22b   :  { %p935_p13 = scmp.ne.s32.totalorder %s1155_s7, %s934_s11  ;;  %p938_p0 = scmp.lt.u32.totalorder %s934_s11, %s1155_s7 }
 0x22d   :  { %p940_p1 = pnand %p938_p0, %p935_p13 }
 0x22f   :  { %943 = shalt.err (!%p940_p1)
}
 0x230   :  { %643 = dma.vmem_to_hbm [thread:$0]  %s641_s30, 16, %s1155_s7, [#allocation5]  }
 0x231   :  { %946 = dma.done.wait [#allocation5], 16  }
 0x232   :  { %947 = vsyncadd [#allocation5], 4294967280 }
 0x233   :  { %647 = vsyncpa [#allocation4], 1 }
 0x234   :  { %648 = vsyncpa [#allocation5], 1 }

</bundles_post_ra>
